<compile_context>
chip_gen: v7x
topology: tpu7x:2x2x1
jax: 0.10.0
libtpu: 0.0.40
codegen_flags: <defaults>
</compile_context>

<pallas_src>
import math

import jax
import jax.numpy as jnp
from jax.experimental import pallas as pl
from jax.experimental.pallas import tpu as pltpu


def _round_up(x, m):
    return ((x + m - 1) // m) * m


def _geglu_kernel(x_ref, wv_ref, wg_ref, bv_ref, bg_ref, o_ref, accv_ref, accg_ref):
    k = pl.program_id(2)

    @pl.when(k == 0)
    def _():
        accv_ref[...] = jnp.zeros_like(accv_ref)
        accg_ref[...] = jnp.zeros_like(accg_ref)

    x = x_ref[...]
    accv_ref[...] += jnp.dot(x, wv_ref[...], preferred_element_type=jnp.float32)
    accg_ref[...] += jnp.dot(x, wg_ref[...], preferred_element_type=jnp.float32)

    @pl.when(k == pl.num_programs(2) - 1)
    def _():
        val = accv_ref[...] + bv_ref[...]
        gate = accg_ref[...] + bg_ref[...]
        # exact (erf) GELU, matching torch.nn.functional.gelu default
        gelu = 0.5 * gate * (1.0 + jax.lax.erf(gate * (1.0 / math.sqrt(2.0))))
        o_ref[...] = (val * gelu).astype(o_ref.dtype)


def geglu(x, w, b, *, tm=256, tn=512, tk=512):
    """GeGLU forward.

    x: [..., d_in] float32
    w: [d_in, 2*d_out]  (== torch nn.Linear(d_in, 2*d_out).weight.T)
    b: [2*d_out]
    returns [..., d_out] float32
    """
    *lead, d_in = x.shape
    d_out = w.shape[1] // 2
    x2 = x.reshape(-1, d_in)
    m, k_dim, n = x2.shape[0], d_in, d_out

    wv, wg = w[:, :d_out], w[:, d_out:]
    bv, bg = b[:d_out], b[d_out:]

    # bf16 operands for the MXU; accumulation stays f32 in VMEM scratch.
    x2 = x2.astype(jnp.bfloat16)
    wv = wv.astype(jnp.bfloat16)
    wg = wg.astype(jnp.bfloat16)

    # Clip tile sizes to the (aligned) problem size; keep N tiles lane-dense.
    # Double-buffered bf16 inputs + two f32 accumulators fit well under a
    # 32 MiB scoped-VMEM budget (safe on v5e/v6e/v7x).
    tm = min(tm, _round_up(m, 16))
    tn = min(tn, _round_up(n, 128))
    tk = min(tk, _round_up(k_dim, 128))
    mp = _round_up(m, tm)
    np_ = _round_up(n, tn)
    kp = _round_up(k_dim, tk)

    # Zero-pad to tile multiples (zeros in K contribute nothing; M/N padding is
    # sliced away after the call).
    x2 = jnp.pad(x2, ((0, mp - m), (0, kp - k_dim)))
    wv = jnp.pad(wv, ((0, kp - k_dim), (0, np_ - n)))
    wg = jnp.pad(wg, ((0, kp - k_dim), (0, np_ - n)))
    bvp = jnp.pad(bv.astype(jnp.float32), (0, np_ - n)).reshape(1, np_)
    bgp = jnp.pad(bg.astype(jnp.float32), (0, np_ - n)).reshape(1, np_)

    grid = (mp // tm, np_ // tn, kp // tk)

    cost = pl.CostEstimate(
        flops=4 * mp * np_ * kp,            # two matmuls, 2*M*N*K each
        transcendentals=mp * np_,           # erf in the epilogue
        bytes_accessed=(x2.size * 2 + wv.size * 2 + wg.size * 2
                        + (bvp.size + bgp.size) * 4 + mp * np_ * 4),
    )

    out = pl.pallas_call(
        _geglu_kernel,
        out_shape=jax.ShapeDtypeStruct((mp, np_), jnp.float32),
        grid_spec=pltpu.PrefetchScalarGridSpec(
            num_scalar_prefetch=0,
            grid=grid,
            in_specs=[
                pl.BlockSpec((tm, tk), lambda i, j, k: (i, k)),   # x tile
                pl.BlockSpec((tk, tn), lambda i, j, k: (k, j)),   # W value half
                pl.BlockSpec((tk, tn), lambda i, j, k: (k, j)),   # W gate half
                pl.BlockSpec((1, tn), lambda i, j, k: (0, j)),    # bias value
                pl.BlockSpec((1, tn), lambda i, j, k: (0, j)),    # bias gate
            ],
            out_specs=pl.BlockSpec((tm, tn), lambda i, j, k: (i, j)),
            scratch_shapes=[
                pltpu.VMEM((tm, tn), jnp.float32),   # value accumulator
                pltpu.VMEM((tm, tn), jnp.float32),   # gate accumulator
            ],
        ),
        compiler_params=pltpu.CompilerParams(
            dimension_semantics=("parallel", "parallel", "arbitrary"),
            vmem_limit_bytes=32 * 1024 * 1024,
        ),
        cost_estimate=cost,
    )(x2, wv, wg, bvp, bgp)

    out = out[:m, :n]
    return out.reshape(*lead, d_out)


if __name__ == "__main__":
    key = jax.random.PRNGKey(0)
    kx, kw, kb = jax.random.split(key, 3)

    # Small shapes consistent with GeGLU(d_in=32, d_out=64) applied to [B, S, d_in].
    batch, seq, d_in, d_out = 2, 8, 32, 64

    x = jax.random.normal(kx, (batch, seq, d_in), dtype=jnp.float32)
    # nn.Linear(d_in, 2*d_out): weight kept pre-transposed as [d_in, 2*d_out].
    w = (0.02 * jax.random.normal(kw, (d_in, 2 * d_out))).astype(jnp.float32)
    b = (0.02 * jax.random.normal(kb, (2 * d_out,))).astype(jnp.float32)

    out = geglu(x, w, b)
    out = jax.block_until_ready(out)

    assert out.shape == (batch, seq, d_out)
    assert out.dtype == jnp.float32

    # pure-JAX f32 reference; loose tolerance since MXU operands are bf16.
    h = x @ w + b
    val, gate = h[..., :d_out], h[..., d_out:]
    ref = val * (0.5 * gate * (1.0 + jax.lax.erf(gate / math.sqrt(2.0))))
    assert jnp.allclose(out, ref, atol=3e-2, rtol=3e-2), float(jnp.max(jnp.abs(out - ref)))

    print("KERNEL_OK")
</pallas_src>

<mosaic_0001>
module attributes {stable_mosaic.version = 11 : i64} {
  func.func @_geglu_kernel(%arg0: i32, %arg1: i32, %arg2: i32, %arg3: memref<16x128xbf16, #tpu.memory_space<vmem>>, %arg4: memref<128x128xbf16, #tpu.memory_space<vmem>>, %arg5: memref<128x128xbf16, #tpu.memory_space<vmem>>, %arg6: memref<1x128xf32, #tpu.memory_space<vmem>>, %arg7: memref<1x128xf32, #tpu.memory_space<vmem>>, %arg8: memref<16x128xf32, #tpu.memory_space<vmem>>, %arg9: memref<16x128xf32, #tpu.memory_space<vmem>>, %arg10: memref<16x128xf32, #tpu.memory_space<vmem>>) attributes {dimension_semantics = [#tpu.dimension_semantics<parallel>, #tpu.dimension_semantics<parallel>, #tpu.dimension_semantics<arbitrary>], iteration_bounds = array<i64: 1, 1, 1>, scalar_prefetch = 0 : i64, scratch_operands = 2 : i64, tpu.core_type = #tpu.core_type<tc>, window_params = [{transform_indices = @transform_0, window_bounds = array<i64: 16, 128>}, {transform_indices = @transform_1, window_bounds = array<i64: 128, 128>}, {transform_indices = @transform_2, window_bounds = array<i64: 128, 128>}, {transform_indices = @transform_3, window_bounds = array<i64: 1, 128>}, {transform_indices = @transform_4, window_bounds = array<i64: 1, 128>}, {transform_indices = @transform_5, window_bounds = array<i64: 16, 128>}]} {
    %c0_i32 = arith.constant 0 : i32
    %0 = arith.cmpi eq, %arg2, %c0_i32 : i32
    %1 = arith.extui %0 : i1 to i32
    %c0_i32_0 = arith.constant 0 : i32
    %2 = arith.cmpi ne, %1, %c0_i32_0 : i32
    scf.if %2 {
      %cst_17 = arith.constant 0.000000e+00 : f32
      %17 = vector.broadcast %cst_17 : f32 to vector<16x128xf32>
      %c0_18 = arith.constant 0 : index
      %c0_19 = arith.constant 0 : index
      %18 = vector.load %arg9[%c0_18, %c0_19] : memref<16x128xf32, #tpu.memory_space<vmem>>, vector<16x128xf32>
      tpu.vector_store %arg9[%c0_18, %c0_19], %17 {strides = array<i32>} : memref<16x128xf32, #tpu.memory_space<vmem>>, vector<16x128xf32>,
      %cst_20 = arith.constant 0.000000e+00 : f32
      %19 = vector.broadcast %cst_20 : f32 to vector<16x128xf32>
      %c0_21 = arith.constant 0 : index
      %c0_22 = arith.constant 0 : index
      %20 = vector.load %arg10[%c0_21, %c0_22] : memref<16x128xf32, #tpu.memory_space<vmem>>, vector<16x128xf32>
      tpu.vector_store %arg10[%c0_21, %c0_22], %19 {strides = array<i32>} : memref<16x128xf32, #tpu.memory_space<vmem>>, vector<16x128xf32>,
    } else {
    }
    %c0 = arith.constant 0 : index
    %c0_1 = arith.constant 0 : index
    %3 = vector.load %arg3[%c0, %c0_1] : memref<16x128xbf16, #tpu.memory_space<vmem>>, vector<16x128xbf16>
    %c0_2 = arith.constant 0 : index
    %c0_3 = arith.constant 0 : index
    %4 = vector.load %arg9[%c0_2, %c0_3] : memref<16x128xf32, #tpu.memory_space<vmem>>, vector<16x128xf32>
    %c0_4 = arith.constant 0 : index
    %c0_5 = arith.constant 0 : index
    %5 = vector.load %arg4[%c0_4, %c0_5] : memref<128x128xbf16, #tpu.memory_space<vmem>>, vector<128x128xbf16>
    %cst = arith.constant dense<0.000000e+00> : vector<16x128xf32>
    %6 = tpu.matmul %3, %5, %cst {dimension_numbers = #tpu.dot_dimension_numbers<[1], [0], [0], [1], [0, 0, 1, 1], [], []>} : vector<16x128xbf16>, vector<128x128xbf16>, vector<16x128xf32> -> vector<16x128xf32>
    %7 = arith.addf %4, %6 : vector<16x128xf32>
    %c0_6 = arith.constant 0 : index
    %c0_7 = arith.constant 0 : index
    %8 = vector.load %arg9[%c0_6, %c0_7] : memref<16x128xf32, #tpu.memory_space<vmem>>, vector<16x128xf32>
    tpu.vector_store %arg9[%c0_6, %c0_7], %7 {strides = array<i32>} : memref<16x128xf32, #tpu.memory_space<vmem>>, vector<16x128xf32>,
    %c0_8 = arith.constant 0 : index
    %c0_9 = arith.constant 0 : index
    %9 = vector.load %arg10[%c0_8, %c0_9] : memref<16x128xf32, #tpu.memory_space<vmem>>, vector<16x128xf32>
    %c0_10 = arith.constant 0 : index
    %c0_11 = arith.constant 0 : index
    %10 = vector.load %arg5[%c0_10, %c0_11] : memref<128x128xbf16, #tpu.memory_space<vmem>>, vector<128x128xbf16>
    %cst_12 = arith.constant dense<0.000000e+00> : vector<16x128xf32>
    %11 = tpu.matmul %3, %10, %cst_12 {dimension_numbers = #tpu.dot_dimension_numbers<[1], [0], [0], [1], [0, 0, 1, 1], [], []>} : vector<16x128xbf16>, vector<128x128xbf16>, vector<16x128xf32> -> vector<16x128xf32>
    %12 = arith.addf %9, %11 : vector<16x128xf32>
    %c0_13 = arith.constant 0 : index
    %c0_14 = arith.constant 0 : index
    %13 = vector.load %arg10[%c0_13, %c0_14] : memref<16x128xf32, #tpu.memory_space<vmem>>, vector<16x128xf32>
    tpu.vector_store %arg10[%c0_13, %c0_14], %12 {strides = array<i32>} : memref<16x128xf32, #tpu.memory_space<vmem>>, vector<16x128xf32>,
    %c0_i32_15 = arith.constant 0 : i32
    %14 = arith.cmpi eq, %arg2, %c0_i32_15 : i32
    %15 = arith.extui %14 : i1 to i32
    %c0_i32_16 = arith.constant 0 : i32
    %16 = arith.cmpi ne, %15, %c0_i32_16 : i32
    scf.if %16 {
      %c0_17 = arith.constant 0 : index
      %c0_18 = arith.constant 0 : index
      %17 = vector.load %arg9[%c0_17, %c0_18] : memref<16x128xf32, #tpu.memory_space<vmem>>, vector<16x128xf32>
      %c0_19 = arith.constant 0 : index
      %c0_20 = arith.constant 0 : index
      %18 = vector.load %arg6[%c0_19, %c0_20] : memref<1x128xf32, #tpu.memory_space<vmem>>, vector<1x128xf32>
      %19 = vector.broadcast %18 : vector<1x128xf32> to vector<16x128xf32>
      %20 = arith.addf %17, %19 : vector<16x128xf32>
      %c0_21 = arith.constant 0 : index
      %c0_22 = arith.constant 0 : index
      %21 = vector.load %arg10[%c0_21, %c0_22] : memref<16x128xf32, #tpu.memory_space<vmem>>, vector<16x128xf32>
      %c0_23 = arith.constant 0 : index
      %c0_24 = arith.constant 0 : index
      %22 = vector.load %arg7[%c0_23, %c0_24] : memref<1x128xf32, #tpu.memory_space<vmem>>, vector<1x128xf32>
      %23 = vector.broadcast %22 : vector<1x128xf32> to vector<16x128xf32>
      %24 = arith.addf %21, %23 : vector<16x128xf32>
      %cst_25 = arith.constant 5.000000e-01 : f32
      %25 = vector.broadcast %cst_25 : f32 to vector<16x128xf32>
      %26 = arith.mulf %25, %24 : vector<16x128xf32>
      %cst_26 = arith.constant 0.707106769 : f32
      %27 = vector.broadcast %cst_26 : f32 to vector<16x128xf32>
      %28 = arith.mulf %24, %27 : vector<16x128xf32>
      %29 = math.erf %28 : vector<16x128xf32>
      %cst_27 = arith.constant 1.000000e+00 : f32
      %30 = vector.broadcast %cst_27 : f32 to vector<16x128xf32>
      %31 = arith.addf %30, %29 : vector<16x128xf32>
      %32 = arith.mulf %26, %31 : vector<16x128xf32>
      %33 = arith.mulf %20, %32 : vector<16x128xf32>
      %c0_28 = arith.constant 0 : index
      %c0_29 = arith.constant 0 : index
      %34 = vector.load %arg8[%c0_28, %c0_29] : memref<16x128xf32, #tpu.memory_space<vmem>>, vector<16x128xf32>
      tpu.vector_store %arg8[%c0_28, %c0_29], %33 {strides = array<i32>} : memref<16x128xf32, #tpu.memory_space<vmem>>, vector<16x128xf32>,
    } else {
    }
    return
  }
  func.func @transform_0(%arg0: i32, %arg1: i32, %arg2: i32) -> (i32, i32) {
    %c0_i32 = arith.constant 0 : i32
    return %arg0, %arg2 : i32, i32
  }
  func.func @transform_1(%arg0: i32, %arg1: i32, %arg2: i32) -> (i32, i32) {
    %c0_i32 = arith.constant 0 : i32
    return %arg2, %arg1 : i32, i32
  }
  func.func @transform_2(%arg0: i32, %arg1: i32, %arg2: i32) -> (i32, i32) {
    %c0_i32 = arith.constant 0 : i32
    return %arg2, %arg1 : i32, i32
  }
  func.func @transform_3(%arg0: i32, %arg1: i32, %arg2: i32) -> (i32, i32) {
    %c0_i32 = arith.constant 0 : i32
    %c0_i32_0 = arith.constant 0 : i32
    return %c0_i32, %arg1 : i32, i32
  }
  func.func @transform_4(%arg0: i32, %arg1: i32, %arg2: i32) -> (i32, i32) {
    %c0_i32 = arith.constant 0 : i32
    %c0_i32_0 = arith.constant 0 : i32
    return %c0_i32, %arg1 : i32, i32
  }
  func.func @transform_5(%arg0: i32, %arg1: i32, %arg2: i32) -> (i32, i32) {
    %c0_i32 = arith.constant 0 : i32
    return %arg0, %arg1 : i32, i32
  }
}

</mosaic_0001>

<bundles_post_ra>
// kernel: tpu_custom_call.1
= control target key start
LH: loop header
LB: loop body
LE: loop exit
PB: predicated region body
PF: predicated region fallthrough
CT: control target
= control target key end

     0   :  { %10 = vsyncpa [#allocation5], 0  ;;  %s670_s0 = inlined_call_operand.hbm [shape: bf16[16,128], index: 0, kind: input, shape index: {}]   ;;  %s671_s1 = inlined_call_operand.hbm [shape: bf16[128,128], index: 1, kind: input, shape index: {}]   ;;  %s672_s2 = inlined_call_operand.hbm [shape: bf16[128,128], index: 2, kind: input, shape index: {}]   ;;  %s673_s3 = inlined_call_operand.vmem [shape: f32[1,128], index: 3, kind: input, shape index: {}]   ;;  %s674_s4 = inlined_call_operand.vmem [shape: f32[1,128], index: 4, kind: input, shape index: {}]   ;;  %s675_s5 = inlined_call_operand.hbm [shape: f32[16,128], index: 5, kind: output, shape index: {}]  }
   0x1   :  { %11 = vsyncpa [#allocation8], 0 }
   0x2   :  { %12 = vsyncpa [#allocation6], 0  ;;  %s560_s18 = smov [#allocation7]   ;;  %s561_s20 = smov [#allocation4]  }
   0x3   :  { %s30_s19 = sshll.u32 %s560_s18, 4  ;;  %s18_s21 = sshll.u32 %s561_s20, 4  ;;  %s31_s19 = int_to_ptr.vmem [resolvable:$true] %s30_s19  ;;  %s600_s21 = int_to_ptr.vmem [resolvable:$true] %s18_s21 }
   0x4   :  { %s466_s24 = scalar_lea.hbm %s671_s1, 1024 }
   0x5   :  { %p467_p0 = scmp.ne.s32.totalorder %s671_s1, %s466_s24  ;;  %p470_p1 = scmp.lt.u32.totalorder %s466_s24, %s671_s1 }
   0x7   :  { %p472_p2 = pnand %p470_p1, %p467_p0 }
   0x9   :  { %475 = shalt.err (!%p472_p2)
}
   0xa   :  { %s476_s29 = scalar_lea.vmem %s31_s19, 1024  ;;  %p481_p4 = scmp.lt.s32.totalorder %s31_s19, %s31_s19 }
   0xb   :  { %p477_p3 = scmp.ne.s32.totalorder %s31_s19, %s476_s29  ;;  %p482_p5 = scmp.lt.s32.totalorder %s476_s29, %s476_s29 }
   0xd   :  { %p483_p6 = por %p482_p5, %p481_p4 }
   0xf   :  { %p484_p7 = pnand %p483_p6, %p477_p3 }
  0x11   :  { %487 = shalt.err (!%p484_p7)
}
  0x12   :  { %s562_s30 = smov 64   ;;  %s563_s6 = smov 4  }
  0x13   :  { %36 = dma.hbm_to_vmem [thread:$0]  %s671_s1, 1024, %s31_s19, [#allocation8], %s562_s30, %s562_s30, %s563_s6  }
  0x14   :  { %s488_s11 = scalar_lea.hbm %s670_s0, 128 }
  0x15   :  { %p489_p8 = scmp.ne.s32.totalorder %s670_s0, %s488_s11  ;;  %p492_p9 = scmp.lt.u32.totalorder %s488_s11, %s670_s0 }
  0x17   :  { %p494_p10 = pnand %p492_p9, %p489_p8 }
  0x19   :  { %497 = shalt.err (!%p494_p10)
}
  0x1a   :  { %s498_s16 = scalar_lea.vmem %s600_s21, 128  ;;  %p503_p12 = scmp.lt.s32.totalorder %s600_s21, %s600_s21 }
  0x1b   :  { %p499_p11 = scmp.ne.s32.totalorder %s600_s21, %s498_s16  ;;  %p504_p13 = scmp.lt.s32.totalorder %s498_s16, %s498_s16 }
  0x1d   :  { %p505_p0 = por %p504_p13, %p503_p12 }
  0x1f   :  { %p506_p1 = pnand %p505_p0, %p499_p11 }
  0x21   :  { %509 = shalt.err (!%p506_p1)
}
  0x22   :  { %24 = dma.hbm_to_vmem [thread:$0]  %s670_s0, 128, %s600_s21, [#allocation5], %s562_s30, %s562_s30, %s563_s6  }
  0x23   :  { %s564_s18 = smov [#allocation9]   ;;  %s510_s23 = scalar_lea.hbm %s672_s2, 1024 }
  0x24   :  { %s42_s19 = sshll.u32 %s564_s18, 4  ;;  %p511_p2 = scmp.ne.s32.totalorder %s672_s2, %s510_s23  ;;  %s43_s19 = int_to_ptr.vmem [resolvable:$true] %s42_s19 }
  0x25   :  { %p514_p3 = scmp.lt.u32.totalorder %s510_s23, %s672_s2 }
  0x27   :  { %p516_p4 = pnand %p514_p3, %p511_p2 }
  0x29   :  { %519 = shalt.err (!%p516_p4)
}
  0x2a   :  { %s520_s28 = scalar_lea.vmem %s43_s19, 1024  ;;  %p525_p6 = scmp.lt.s32.totalorder %s43_s19, %s43_s19 }
  0x2b   :  { %p521_p5 = scmp.ne.s32.totalorder %s43_s19, %s520_s28  ;;  %p526_p7 = scmp.lt.s32.totalorder %s520_s28, %s520_s28 }
  0x2d   :  { %p527_p8 = por %p526_p7, %p525_p6 }
  0x2f   :  { %p528_p9 = pnand %p527_p8, %p521_p5 }
  0x31   :  { %531 = shalt.err (!%p528_p9)
}
  0x32   :  { %48 = dma.hbm_to_vmem [thread:$0]  %s672_s2, 1024, %s43_s19, [#allocation8], %s562_s30, %s562_s30, %s563_s6  }
  0x33   :  { %554 = dma.done.wait [#allocation5], 128  }
  0x34   :  { %555 = vsyncadd [#allocation5], 4294967168 }
  0x35   :  { %556 = dma.done.wait [#allocation8], 2048  }
  0x36   :  { %557 = vsyncadd [#allocation8], 4294965248  ;;  %v565_v0 = vmov 0.0   ;;  %vm566_vm0 = vmmov 0   ;;  %v445_v1 = vld [vmem:[#allocation9] sm:$0xff]   ;;  %v446_v2 = vld [vmem:[#allocation9 + $0x8] sm:$0xff]  }
  0x37   :  { %415 = vmatprep.subr.bf16.mxu1 %v565_v0  ;;  %395 = vmatprep.subr.bf16.mxu0 %v565_v0  ;;  %v449_v3 = vld [vmem:[#allocation7] sm:$0xff]   ;;  %v447_v4 = vld [vmem:[#allocation9 + $0x10] sm:$0xff]   ;;  %v451_v5 = vld [vmem:[#allocation7 + $0x8] sm:$0xff]  }
  0x38   :  { %431 = vmatprep.mubr.msk.bf16.mxu1 %vm566_vm0, %v565_v0  ;;  %411 = vmatprep.mubr.msk.bf16.mxu0 %vm566_vm0, %v565_v0  ;;  %v448_v6 = vld [vmem:[#allocation9 + $0x18] sm:$0xff]   ;;  %v453_v7 = vld [vmem:[#allocation7 + $0x10] sm:$0xff]   ;;  %v450_v8 = vld [vmem:[#allocation9 + $0x20] sm:$0xff]  }
  0x39   :  { %416 = vmatpush3.bf16.msra.mxu1 %v445_v1  ;;  %396 = vmatpush3.bf16.msra.mxu0 %v449_v3  ;;  %v455_v9 = vld [vmem:[#allocation7 + $0x18] sm:$0xff]   ;;  %v452_v10 = vld [vmem:[#allocation9 + $0x28] sm:$0xff]   ;;  %v457_v11 = vld [vmem:[#allocation7 + $0x20] sm:$0xff]  }
  0x3a   :  { %417 = vmatprep.subr.bf16.mxu1 %v565_v0  ;;  %397 = vmatprep.subr.bf16.mxu0 %v565_v0  ;;  %v454_v12 = vld [vmem:[#allocation9 + $0x30] sm:$0xff]   ;;  %v459_v13 = vld [vmem:[#allocation7 + $0x28] sm:$0xff]   ;;  %v456_v14 = vld [vmem:[#allocation9 + $0x38] sm:$0xff]  }
  0x3b   :  { %v460_v15 = vld [vmem:[#allocation7 + $0x30] sm:$0xff]   ;;  %v458_v16 = vld [vmem:[#allocation4] sm:$0xff]  }
  0x3c   :  { %v461_v17 = vld [vmem:[#allocation7 + $0x38] sm:$0xff]  }
  0x3d   :  { %418 = vmatpush3.bf16.msra.mxu1 %v446_v2  ;;  %398 = vmatpush3.bf16.msra.mxu0 %v451_v5  ;;  %v376_v18 = vld [vmem:[%s674_s4] ss:$0 sm:$0xff]  ;;  %s567_s4 = smov [#allocation10]  }
  0x3e   :  { %419 = vmatprep.subr.bf16.mxu1 %v565_v0  ;;  %399 = vmatprep.subr.bf16.mxu0 %v565_v0  ;;  %v375_v31 = vld [vmem:[%s673_s3] ss:$0 sm:$0xff]  ;;  %s345_s7 = sshll.u32 %s567_s4, 4  ;;  %s346_s7 = int_to_ptr.vmem [resolvable:$true] %s345_s7 }
  0x3f   :  { %s532_s8 = scalar_lea.vmem %s346_s7, 256  ;;  %p537_p11 = scmp.lt.s32.totalorder %s346_s7, %s346_s7 }
  0x40   :  { %p533_p10 = scmp.ne.s32.totalorder %s346_s7, %s532_s8  ;;  %p538_p12 = scmp.lt.s32.totalorder %s532_s8, %s532_s8 }
  0x41   :  { %420 = vmatpush3.bf16.msra.mxu1 %v447_v4  ;;  %400 = vmatpush3.bf16.msra.mxu0 %v453_v7 }
  0x42   :  { %421 = vmatprep.subr.bf16.mxu1 %v565_v0  ;;  %401 = vmatprep.subr.bf16.mxu0 %v565_v0  ;;  %p539_p13 = por %p538_p12, %p537_p11 }
  0x44   :  { %p540_p0 = pnand %p539_p13, %p533_p10 }
  0x45   :  { %422 = vmatpush3.bf16.msra.mxu1 %v448_v6  ;;  %402 = vmatpush3.bf16.msra.mxu0 %v455_v9 }
  0x46   :  { %423 = vmatprep.subr.bf16.mxu1 %v565_v0  ;;  %403 = vmatprep.subr.bf16.mxu0 %v565_v0 }
  0x49   :  { %424 = vmatpush3.bf16.msra.mxu1 %v450_v8  ;;  %404 = vmatpush3.bf16.msra.mxu0 %v457_v11 }
  0x4a   :  { %425 = vmatprep.subr.bf16.mxu1 %v565_v0  ;;  %405 = vmatprep.subr.bf16.mxu0 %v565_v0 }
  0x4d   :  { %426 = vmatpush3.bf16.msra.mxu1 %v452_v10  ;;  %406 = vmatpush3.bf16.msra.mxu0 %v459_v13 }
  0x4e   :  { %427 = vmatprep.subr.bf16.mxu1 %v565_v0  ;;  %407 = vmatprep.subr.bf16.mxu0 %v565_v0 }
  0x51   :  { %428 = vmatpush3.bf16.msra.mxu1 %v454_v12  ;;  %408 = vmatpush3.bf16.msra.mxu0 %v460_v15 }
  0x52   :  { %429 = vmatprep.subr.bf16.mxu1 %v565_v0  ;;  %409 = vmatprep.subr.bf16.mxu0 %v565_v0 }
  0x55   :  { %430 = vmatpush3.bf16.msra.mxu1 %v456_v14  ;;  %410 = vmatpush3.bf16.msra.mxu0 %v461_v17 }
  0x58   :  { %432 = vmatmul.mubr.bf16.vlgmr.msra.gmra.mrb[0].mxu1 %v458_v16  ;;  %412 = vmatmul.mubr.bf16.vlgmr.msra.gmra.mrb[0].mxu0 %v458_v16 }
 0x12b   :  { %v290_v19 = vpop.f32.mrb[0].mxu1  ;;  %v179_v26 = vpop.f32.mrb[0].mxu0 }
 0x12c   :  { %v324_v20 = vadd.f32 %v376_v18, %v290_v19  ;;  %v433_v21 = vpop.f32.mrb[1].mxu1  ;;  %v413_v28 = vpop.f32.mrb[1].mxu0  ;;  %v313_v35 = vadd.f32 %v375_v31, %v179_v26 }
 0x12d   :  { %v293_v22 = vpop.f32.mrb[2].mxu1  ;;  %v182_v29 = vpop.f32.mrb[2].mxu0 }
 0x12e   :  { %v328_v23 = vmul.f32 0.70710677, %v324_v20  ;;  %v325_v24 = vadd.f32 %v376_v18, %v293_v22  ;;  %v434_v25 = vpop.f32.mrb[3].mxu1  ;;  %v414_v30 = vpop.f32.mrb[3].mxu0  ;;  %v326_v33 = vmul.f32 0.5, %v324_v20  ;;  %v314_v41 = vadd.f32 %v375_v31, %v182_v29 }
 0x130   :  { %462 = verf.f32 %v328_v23  ;;  %v329_v27 = vmul.f32 0.70710677, %v325_v24  ;;  %v327_v37 = vmul.f32 0.5, %v325_v24 }
 0x132   :  { %464 = verf.f32 %v329_v27 }
 0x13a   :  { %v463_v32 = vpop.eup %462 }
 0x13b   :  { %v332_v34 = vadd.f32 1.0, %v463_v32 }
 0x13c   :  { %v465_v36 = vpop.eup %464 }
 0x13d   :  { %v333_v38 = vadd.f32 1.0, %v465_v36  ;;  %v334_v39 = vmul.f32 %v332_v34, %v326_v33 }
 0x13f   :  { %v336_v40 = vmul.f32 %v334_v39, %v313_v35  ;;  %v335_v42 = vmul.f32 %v333_v38, %v327_v37 }
 0x141   :  { %338 = vst [vmem:[#allocation10] sm:$0xff] %v336_v40  ;;  %v337_v43 = vmul.f32 %v335_v42, %v314_v41 }
 0x143   :  { %339 = vst [vmem:[#allocation10 + $0x8] sm:$0xff] %v337_v43 }
 0x144   :  { %543 = shalt.err (!%p540_p0)
}
 0x145   :  { %s544_s10 = scalar_lea.hbm %s675_s5, 256 }
 0x146   :  { %p545_p1 = scmp.ne.s32.totalorder %s675_s5, %s544_s10  ;;  %p548_p2 = scmp.lt.u32.totalorder %s544_s10, %s675_s5 }
 0x148   :  { %p550_p3 = pnand %p548_p2, %p545_p1 }
 0x14a   :  { %553 = shalt.err (!%p550_p3)
}
 0x14b   :  { %s568_s15 = smov 128   ;;  %s569_s16 = smov 8  }
 0x14c   :  { %351 = dma.vmem_to_hbm [thread:$0]  %s346_s7, 256, %s675_s5, [#allocation6], %s568_s15, %s568_s15, %s569_s16  }
 0x14d   :  { %558 = dma.done.wait [#allocation6], 256  }
 0x14e   :  { %559 = vsyncadd [#allocation6], 4294967040 }
 0x14f   :  { %355 = vsyncpa [#allocation5], 1 }
 0x150   :  { %356 = vsyncpa [#allocation8], 1 }
 0x151   :  { %357 = vsyncpa [#allocation6], 1 }

</bundles_post_ra>
